<compile_context>
chip_gen: v7x
topology: tpu7x:2x2x1
jax: 0.10.0
libtpu: 0.0.40
codegen_flags: <defaults>
</compile_context>

<pallas_src>
import jax
import jax.numpy as jnp
from jax.experimental import pallas as pl
from jax.experimental.pallas import tpu as pltpu


def _tab_encoder_kernel(xt_ref, w1_ref, b1_ref, w2_ref, b2_ref, o_ref):
    # (24,7) bf16 @ (7,bt) bf16 -> (24,bt) with f32 accumulation on the MXU.
    h = jnp.dot(w1_ref[...], xt_ref[...], preferred_element_type=jnp.float32)
    h = jnp.maximum(h + b1_ref[...], 0.0)          # bias (24,1) broadcasts over lanes
    # Dropout(0.2): identity in eval mode.
    # (24,24) bf16 @ (24,bt) bf16 -> (24,bt) f32.
    out = jnp.dot(w2_ref[...], h.astype(jnp.bfloat16),
                  preferred_element_type=jnp.float32)
    o_ref[...] = (out + b2_ref[...]).astype(o_ref.dtype)


def tab_encoder_forward(x, w1, b1, w2, b2, *, block_b=2048):
    """x:(B,7) f32. w1:(24,7), b1:(24,), w2:(24,24), b2:(24,) (PyTorch layouts).

    Returns (B,24) bfloat16. Activations move HBM<->VMEM in bf16 (op is
    bandwidth-bound); both matmuls accumulate in f32.
    """
    B = x.shape[0]
    d_in, d_hid = 7, 24

    # Batch tile: multiple of 128 (lane granularity), capped by the padded batch.
    bt = min(block_b, ((B + 127) // 128) * 128)
    bp = ((B + bt - 1) // bt) * bt                 # padded batch
    grid = (bp // bt,)

    # Transposed bf16 activations: (7, Bp); zero-pad the lane (batch) tail.
    xt = x.astype(jnp.bfloat16).T
    if bp != B:
        xt = jnp.pad(xt, ((0, 0), (0, bp - B)))

    w1b = w1.astype(jnp.bfloat16)                  # (24, 7)
    w2b = w2.astype(jnp.bfloat16)                  # (24, 24)
    b1c = b1.reshape(d_hid, 1).astype(jnp.float32)
    b2c = b2.reshape(d_hid, 1).astype(jnp.float32)

    # Weights/biases: constant index_map -> stay resident across grid steps.
    resident = lambda shape: pl.BlockSpec(shape, lambda i: (0, 0))

    cost = pl.CostEstimate(
        flops=2 * bp * (d_in * d_hid + d_hid * d_hid),
        transcendentals=0,
        bytes_accessed=bp * (d_in + d_hid) * 2
        + (w1b.size + w2b.size) * 2 + (b1c.size + b2c.size) * 4,
    )

    out_t = pl.pallas_call(
        _tab_encoder_kernel,
        out_shape=jax.ShapeDtypeStruct((d_hid, bp), jnp.bfloat16),
        grid=grid,
        in_specs=[
            pl.BlockSpec((d_in, bt), lambda i: (0, i)),    # x^T: tiled on batch
            resident((d_hid, d_in)),                        # w1
            resident((d_hid, 1)),                           # b1
            resident((d_hid, d_hid)),                       # w2
            resident((d_hid, 1)),                           # b2
        ],
        out_specs=pl.BlockSpec((d_hid, bt), lambda i: (0, i)),
        compiler_params=pltpu.CompilerParams(
            dimension_semantics=("parallel",),     # v7x: shard batch over 2 TCs
            vmem_limit_bytes=48 * 1024 * 1024,     # fits v7x's 64 MiB with headroom
        ),
        cost_estimate=cost,
    )(xt, w1b, b1c, w2b, b2c)

    return out_t[:, :B].T                          # (B, 24) bf16, layout plumbing


def init_params(key):
    """Deterministic init mirroring nn.Linear defaults; PyTorch (out,in) layout."""
    k1, k2, k3, k4 = jax.random.split(key, 4)
    bound1 = 1.0 / (7 ** 0.5)
    bound2 = 1.0 / (24 ** 0.5)
    w1 = jax.random.uniform(k1, (24, 7), jnp.float32, -bound1, bound1)
    b1 = jax.random.uniform(k2, (24,), jnp.float32, -bound1, bound1)
    w2 = jax.random.uniform(k3, (24, 24), jnp.float32, -bound2, bound2)
    b2 = jax.random.uniform(k4, (24,), jnp.float32, -bound2, bound2)
    return w1, b1, w2, b2


if __name__ == "__main__":
    key = jax.random.PRNGKey(0)
    k_params, k_x = jax.random.split(key)

    w1, b1, w2, b2 = init_params(k_params)

    B = 8
    x = jax.random.normal(k_x, (B, 7), jnp.float32)

    out = tab_encoder_forward(x, w1, b1, w2, b2)
    out = jax.block_until_ready(out)

    # Pure-JAX reference mirroring the kernel's bf16 input rounding
    # (eval-mode dropout == identity).
    f32 = lambda a: a.astype(jnp.bfloat16).astype(jnp.float32)
    h_ref = jnp.maximum(f32(x) @ f32(w1).T + b1, 0.0)
    ref = f32(h_ref) @ f32(w2).T + b2

    assert out.shape == (B, 24)
    assert out.dtype == jnp.bfloat16
    assert jnp.allclose(out.astype(jnp.float32), ref, atol=2e-2, rtol=2e-2)

    print("KERNEL_OK")
</pallas_src>

<mosaic_0001>
module attributes {stable_mosaic.version = 11 : i64} {
  func.func @_tab_encoder_kernel(%arg0: i32, %arg1: memref<7x128xbf16, #tpu.memory_space<vmem>>, %arg2: memref<24x7xbf16, #tpu.memory_space<vmem>>, %arg3: memref<24x1xf32, #tpu.memory_space<vmem>>, %arg4: memref<24x24xbf16, #tpu.memory_space<vmem>>, %arg5: memref<24x1xf32, #tpu.memory_space<vmem>>, %arg6: memref<24x128xbf16, #tpu.memory_space<vmem>>) attributes {dimension_semantics = [#tpu.dimension_semantics<parallel>], iteration_bounds = array<i64: 1>, scalar_prefetch = 0 : i64, scratch_operands = 0 : i64, tpu.core_type = #tpu.core_type<tc>, window_params = [{transform_indices = @transform_0, window_bounds = array<i64: 7, 128>}, {pipeline_mode = #tpu.pipeline_mode<synchronous>, transform_indices = @transform_1, window_bounds = array<i64: 24, 7>}, {pipeline_mode = #tpu.pipeline_mode<synchronous>, transform_indices = @transform_2, window_bounds = array<i64: 24, 1>}, {pipeline_mode = #tpu.pipeline_mode<synchronous>, transform_indices = @transform_3, window_bounds = array<i64: 24, 24>}, {pipeline_mode = #tpu.pipeline_mode<synchronous>, transform_indices = @transform_4, window_bounds = array<i64: 24, 1>}, {transform_indices = @transform_5, window_bounds = array<i64: 24, 128>}]} {
    %c0 = arith.constant 0 : index
    %c0_0 = arith.constant 0 : index
    %0 = vector.load %arg2[%c0, %c0_0] : memref<24x7xbf16, #tpu.memory_space<vmem>>, vector<24x7xbf16>
    %c0_1 = arith.constant 0 : index
    %c0_2 = arith.constant 0 : index
    %1 = vector.load %arg1[%c0_1, %c0_2] : memref<7x128xbf16, #tpu.memory_space<vmem>>, vector<7x128xbf16>
    %cst = arith.constant dense<0.000000e+00> : vector<24x128xf32>
    %2 = tpu.matmul %0, %1, %cst {dimension_numbers = #tpu.dot_dimension_numbers<[1], [0], [0], [1], [0, 0, 1, 1], [], []>} : vector<24x7xbf16>, vector<7x128xbf16>, vector<24x128xf32> -> vector<24x128xf32>
    %c0_3 = arith.constant 0 : index
    %c0_4 = arith.constant 0 : index
    %3 = vector.load %arg3[%c0_3, %c0_4] : memref<24x1xf32, #tpu.memory_space<vmem>>, vector<24x1xf32>
    %4 = vector.broadcast %3 : vector<24x1xf32> to vector<24x128xf32>
    %5 = arith.addf %2, %4 : vector<24x128xf32>
    %cst_5 = arith.constant 0.000000e+00 : f32
    %6 = vector.broadcast %cst_5 : f32 to vector<24x128xf32>
    %7 = arith.maximumf %5, %6 : vector<24x128xf32>
    %c0_6 = arith.constant 0 : index
    %c0_7 = arith.constant 0 : index
    %8 = vector.load %arg4[%c0_6, %c0_7] : memref<24x24xbf16, #tpu.memory_space<vmem>>, vector<24x24xbf16>
    %9 = arith.truncf %7 : vector<24x128xf32> to vector<24x128xbf16>
    %cst_8 = arith.constant dense<0.000000e+00> : vector<24x128xf32>
    %10 = tpu.matmul %8, %9, %cst_8 {dimension_numbers = #tpu.dot_dimension_numbers<[1], [0], [0], [1], [0, 0, 1, 1], [], []>} : vector<24x24xbf16>, vector<24x128xbf16>, vector<24x128xf32> -> vector<24x128xf32>
    %c0_9 = arith.constant 0 : index
    %c0_10 = arith.constant 0 : index
    %11 = vector.load %arg5[%c0_9, %c0_10] : memref<24x1xf32, #tpu.memory_space<vmem>>, vector<24x1xf32>
    %12 = vector.broadcast %11 : vector<24x1xf32> to vector<24x128xf32>
    %13 = arith.addf %10, %12 : vector<24x128xf32>
    %14 = arith.truncf %13 : vector<24x128xf32> to vector<24x128xbf16>
    %c0_11 = arith.constant 0 : index
    %c0_12 = arith.constant 0 : index
    %15 = vector.load %arg6[%c0_11, %c0_12] : memref<24x128xbf16, #tpu.memory_space<vmem>>, vector<24x128xbf16>
    tpu.vector_store %arg6[%c0_11, %c0_12], %14 {strides = array<i32>} : memref<24x128xbf16, #tpu.memory_space<vmem>>, vector<24x128xbf16>,
    return
  }
  func.func @transform_0(%arg0: i32) -> (i32, i32) {
    %c0_i32 = arith.constant 0 : i32
    %c0_i32_0 = arith.constant 0 : i32
    return %c0_i32, %arg0 : i32, i32
  }
  func.func @transform_1(%arg0: i32) -> (i32, i32) {
    %c0_i32 = arith.constant 0 : i32
    %c0_i32_0 = arith.constant 0 : i32
    %c0_i32_1 = arith.constant 0 : i32
    return %c0_i32, %c0_i32_0 : i32, i32
  }
  func.func @transform_2(%arg0: i32) -> (i32, i32) {
    %c0_i32 = arith.constant 0 : i32
    %c0_i32_0 = arith.constant 0 : i32
    %c0_i32_1 = arith.constant 0 : i32
    return %c0_i32, %c0_i32_0 : i32, i32
  }
  func.func @transform_3(%arg0: i32) -> (i32, i32) {
    %c0_i32 = arith.constant 0 : i32
    %c0_i32_0 = arith.constant 0 : i32
    %c0_i32_1 = arith.constant 0 : i32
    return %c0_i32, %c0_i32_0 : i32, i32
  }
  func.func @transform_4(%arg0: i32) -> (i32, i32) {
    %c0_i32 = arith.constant 0 : i32
    %c0_i32_0 = arith.constant 0 : i32
    %c0_i32_1 = arith.constant 0 : i32
    return %c0_i32, %c0_i32_0 : i32, i32
  }
  func.func @transform_5(%arg0: i32) -> (i32, i32) {
    %c0_i32 = arith.constant 0 : i32
    %c0_i32_0 = arith.constant 0 : i32
    return %c0_i32, %arg0 : i32, i32
  }
}

</mosaic_0001>

<bundles_post_ra>
// kernel: tpu_custom_call.1
= control target key start
LH: loop header
LB: loop body
LE: loop exit
PB: predicated region body
PF: predicated region fallthrough
CT: control target
= control target key end

     0   :  { %vm59_vm0 = vcmask 1042432   ;;  %vm60_vm1 = vcmask 1043456   ;;  %v314_v2 = vmov 65535   ;;  %vm52_vm2 = vcmask 56320   ;;  %s401_s0 = inlined_call_operand.vmem [shape: bf16[7,128], index: 0, kind: input, shape index: {}]   ;;  %s402_s1 = inlined_call_operand.vmem [shape: bf16[24,7], index: 1, kind: input, shape index: {}]   ;;  %s403_s2 = inlined_call_operand.vmem [shape: f32[24,1], index: 2, kind: input, shape index: {}]   ;;  %s404_s3 = inlined_call_operand.vmem [shape: bf16[24,24], index: 3, kind: input, shape index: {}]   ;;  %s405_s4 = inlined_call_operand.vmem [shape: f32[24,1], index: 4, kind: input, shape index: {}]   ;;  %s406_s5 = inlined_call_operand.hbm [shape: bf16[24,128], index: 5, kind: output, shape index: {}]  }
   0x1   :  { %v25_v0 = vld [vmem:[%s401_s0] sm:$0xf]  ;;  %v61_v3 = vsel %vm59_vm0, 4294967295, %v314_v2  ;;  %v315_v6 = vmov 0   ;;  %v28_v8 = vld [vmem:[%s403_s2 + $0x10] sm:$0xff]  ;;  %v27_v10 = vld [vmem:[%s403_s2 + $0x8] sm:$0xff] }
   0x2   :  { %v286_v1 = vld [vmem:[%s402_s1] sm:$0xff]   ;;  %v62_v4 = vsel %vm60_vm1, %v61_v3, 0  ;;  %284 = vset.pattern.permute.xlu0 %v315_v6  ;;  %285 = vset.pattern.permute.xlu1 %v315_v6  ;;  %v287_v9 = vld [vmem:[%s402_s1 + $0x8] ss:$0 sps:$4 sm:$0xff]  }
   0x3   :  { %266 = vmatprep.mubr.msk.bf16.mxu0 %vm52_vm2, %v286_v1  ;;  %v64_v5 = vand.u32 %v62_v4, %v25_v0  ;;  %v26_v7 = vld [vmem:[%s403_s2] sm:$0xff]  ;;  %41 = vperm.xlu1 %285, %v28_v8  }
   0x4   :  { %31 = vperm.xlu0 %284, %v26_v7   ;;  %v122_v11 = vld [vmem:[%s405_s4] sm:$0xff] }
   0x5   :  { %264 = vmatprep.subr.bf16.mxu0 %v64_v5 }
   0x6   :  { %265 = vmatpush3.bf16.msra.mxu0 %v64_v5 }
   0x7   :  { %10 = vsyncpa [#allocation3], 0  ;;  %127 = vperm.xlu1 %285, %v122_v11   ;;  %v123_v12 = vld [vmem:[%s405_s4 + $0x8] sm:$0xff]  ;;  %v124_v13 = vld [vmem:[%s405_s4 + $0x10] sm:$0xff]  ;;  %vm148_vm3 = vcmask 195584   ;;  %s316_s11 = smov [#allocation2]  }
   0x8   :  { %36 = vperm.xlu0 %284, %v27_v10   ;;  %v288_v14 = vld [vmem:[%s404_s3] sm:$0xff]   ;;  %v289_v31 = vld [vmem:[%s404_s3 + $0x8] ss:$0 sps:$4 sm:$0xff]   ;;  %s227_s12 = sshll.u32 %s316_s11, 4  ;;  %s228_s12 = int_to_ptr.vmem [resolvable:$true] %s227_s12 }
   0x9   :  { %267 = vmatmul.mubr.msk.bf16.vlgmr.msra.gmra.mrb[0].mxu0 %vm52_vm2, %v287_v9  ;;  %274 = vmatprep.mubr.msk.bf16.mxu1 %vm148_vm3, %v288_v14  ;;  %s290_s3 = scalar_lea.vmem %s228_s12, 192  ;;  %p295_p1 = scmp.lt.s32.totalorder %s228_s12, %s228_s12 }
   0xa   :  { %p291_p0 = scmp.ne.s32.totalorder %s228_s12, %s290_s3  ;;  %p296_p2 = scmp.lt.s32.totalorder %s290_s3, %s290_s3 }
   0xb   :  { %137 = vperm.xlu1 %285, %v124_v13  }
   0xc   :  { %132 = vperm.xlu0 %284, %v123_v12   ;;  %p297_p3 = por %p296_p2, %p295_p1 }
   0xe   :  { %p298_p4 = pnand %p297_p3, %p291_p0 }
  0x82   :  { %v42_v16 = vpop.permute.xlu1 %41 }
  0x83   :  { %v32_v15 = vpop.permute.xlu0 %31 }
  0x86   :  { %v128_v32 = vpop.permute.xlu1 %127 }
  0x87   :  { %v37_v22 = vpop.permute.xlu0 %36 }
  0x8a   :  { %v138_v33 = vpop.permute.xlu1 %137 }
  0x8b   :  { %v133_v38 = vpop.permute.xlu0 %132 }
  0xdc   :  { %v268_v17 = vpop.f32.mrb[0].mxu0 }
  0xdd   :  { %v100_v18 = vpop.f32.mrb[1].mxu0  ;;  %v109_v19 = vadd.f32 %v268_v17, %v42_v16 }
  0xde   :  { %v101_v20 = vadd.f32 %v100_v18, %v32_v15  ;;  %v269_v21 = vpop.f32.mrb[2].mxu0 }
  0xdf   :  { %v103_v23 = vpop.f32.mrb[3].mxu0  ;;  %v116_v25 = vmax.f32 %v109_v19, 0.0 }
  0xe0   :  { %v104_v24 = vadd.f32 %v103_v23, %v37_v22  ;;  %v114_v26 = vmax.f32 %v101_v20, 0.0 }
  0xe1   :  { %v121_v29 = vpack.c.bf16 %v116_v25, %v116_v25 }
  0xe2   :  { %v115_v27 = vmax.f32 %v104_v24, 0.0 }
  0xe3   :  { %v156_v30 = vsel %vm60_vm1, %v121_v29, 0 }
  0xe4   :  { %v120_v28 = vpack.c.bf16 %v115_v27, %v114_v26 }
  0xe6   :  { %270 = vmatprep.subr.bf16.mxu1 %v120_v28 }
  0xe7   :  { %271 = vmatpush3.bf16.msra.mxu1 %v120_v28 }
  0xe8   :  { %278 = vmatprep.subr.msk.bf16.mxu1 %vm60_vm1, %v121_v29 }
  0xeb   :  { %273 = vmatpush3.bf16.msra.mxu1 %v156_v30 }
  0xee   :  { %275 = vmatmul.mubr.msk.bf16.vlgmr.msra.gmra.mrb[0].mxu1 %vm148_vm3, %v289_v31 }
 0x1c1   :  { %v276_v34 = vpop.f32.mrb[0].mxu1 }
 0x1c2   :  { %v201_v35 = vadd.f32 %v276_v34, %v138_v33  ;;  %v192_v36 = vpop.f32.mrb[1].mxu1 }
 0x1c3   :  { %v277_v37 = vpop.f32.mrb[2].mxu1  ;;  %v193_v41 = vadd.f32 %v192_v36, %v128_v32 }
 0x1c4   :  { %v251_v39 = vpack.c.bf16 %v201_v35, %v201_v35  ;;  %v195_v40 = vpop.f32.mrb[3].mxu1 }
 0x1c5   :  { %v196_v42 = vadd.f32 %v195_v40, %v133_v38 }
 0x1c6   :  { %221 = vst [vmem:[#allocation2 + $0x8] sm:$0xf] %v251_v39 }
 0x1c7   :  { %v255_v43 = vpack.c.bf16 %v196_v42, %v193_v41 }
 0x1c9   :  { %256 = vst [vmem:[#allocation2] sm:$0xff] %v255_v43  }
 0x1ca   :  { %301 = shalt.err (!%p298_p4)
}
 0x1cb   :  { %s302_s15 = scalar_lea.hbm %s406_s5, 192 }
 0x1cc   :  { %p303_p5 = scmp.ne.s32.totalorder %s406_s5, %s302_s15  ;;  %p306_p6 = scmp.lt.u32.totalorder %s302_s15, %s406_s5 }
 0x1ce   :  { %p308_p7 = pnand %p306_p6, %p303_p5 }
 0x1d0   :  { %311 = shalt.err (!%p308_p7)
}
 0x1d1   :  { %s317_s20 = smov 64   ;;  %s318_s21 = smov 4  }
 0x1d2   :  { %233 = dma.vmem_to_hbm [thread:$0]  %s228_s12, 192, %s406_s5, [#allocation3], %s317_s20, %s317_s20, %s318_s21  }
 0x1d3   :  { %312 = dma.done.wait [#allocation3], 192  }
 0x1d4   :  { %313 = vsyncadd [#allocation3], 4294967104 }
 0x1d5   :  { %237 = vsyncpa [#allocation3], 1 }

</bundles_post_ra>
